<compile_context>
chip_gen: v7x
topology: tpu7x:2x2x1
jax: 0.10.0
libtpu: 0.0.40
codegen_flags: <defaults>
</compile_context>

<pallas_src>
import jax
import jax.numpy as jnp
from jax.experimental import pallas as pl
from jax.experimental.pallas import tpu as pltpu

FP = 128  # lane-padded feature width (all real feature dims must be <= 128)


def _round_up(x, m):
    return ((x + m - 1) // m) * m


def _relu(x):
    return jnp.maximum(x, 0.0)


def _lin(x, w_ref, b_ref, off, width=FP):
    """bf16-operand MXU matmul with f32 accumulation + f32 bias add."""
    w = w_ref[:, pl.ds(off, width)]
    b = b_ref[:, pl.ds(off, width)]
    return jnp.dot(x.astype(jnp.bfloat16), w,
                   preferred_element_type=jnp.float32) + b


# ------------------------------ kernel bodies -------------------------------

def _make_node_pre_kernel(dense_layer_num):
    def kernel(feat_ref, w_ref, b_ref, hx_ref, vsk_ref, vrk_ref, vi_ref):
        h = feat_ref[...]
        off = 0
        for _ in range(dense_layer_num):
            h = _relu(_lin(h, w_ref, b_ref, off))
            off += FP
        hx_ref[...] = h
        # fused (vsk | vrk) projection -> one lane-dense [128,256] matmul
        vskr = _lin(h, w_ref, b_ref, off, 2 * FP)
        off += 2 * FP
        vsk_ref[...] = vskr[:, :FP]
        vrk_ref[...] = vskr[:, FP:]
        vi_ref[...] = _lin(h, w_ref, b_ref, off)
    return kernel


def _make_edge_kernel(dense_layer_num, mlp_layer, n_flag, edge_tile, n_edges):
    def kernel(src_ref, dst_ref, efeat_ref, vsk_ref, vrk_ref, w_ref, b_ref,
               eout_ref, agg_ref, vk_scr, epre_scr):
        k = pl.program_id(0)
        base = k * edge_tile

        @pl.when(k == 0)
        def _init():
            agg_ref[...] = jnp.zeros_like(agg_ref)

        # ---- edge dense stack + ek projection ----
        he = efeat_ref[...]
        off = 0
        for _ in range(dense_layer_num):
            he = _relu(_lin(he, w_ref, b_ref, off))
            off += FP
        ek = _lin(he, w_ref, b_ref, off)
        off += FP

        # ---- u_add_v: vk[e] = vsk[src[e]] + vrk[dst[e]] (index gather) ----
        @pl.loop(0, edge_tile)
        def _gather(t):
            s = src_ref[base + t]
            d = dst_ref[base + t]
            vk_scr[pl.ds(t, 1), :] = (vsk_ref[pl.ds(s, 1), :] +
                                      vrk_ref[pl.ds(d, 1), :])

        e = _relu(vk_scr[...] + ek)
        for _ in range(1, mlp_layer):
            e = _relu(_lin(e, w_ref, b_ref, off))
            off += FP

        # ---- mean aggregation (sum part): scatter pre-residual edge rows onto
        #      destination nodes; 1/deg is applied in the node-update kernel ----
        epre_scr[...] = e

        @pl.loop(0, edge_tile)
        def _scatter(t):
            d = dst_ref[base + t]
            valid = jnp.where(base + t < n_edges, 1.0, 0.0)  # mask padded edges
            agg_ref[pl.ds(d, 1), :] = (agg_ref[pl.ds(d, 1), :] +
                                       epre_scr[pl.ds(t, 1), :] * valid)

        # ---- residual ----
        if n_flag == 0:
            eout_ref[...] = e + he
        else:
            eout_ref[...] = e + efeat_ref[...]
    return kernel


def _make_node_update_kernel(mlp_layer):
    def kernel(agg_ref, invdeg_ref, vi_ref, res_ref, w_ref, b_ref, vout_ref):
        agg_mean = agg_ref[...] * invdeg_ref[...]          # [tn,128] * [tn,1]
        v = _relu(vi_ref[...] + _lin(agg_mean, w_ref, b_ref, 0))
        off = FP
        for _ in range(1, mlp_layer):
            v = _relu(_lin(v, w_ref, b_ref, off))
            off += FP
        vout_ref[...] = v + res_ref[...]
    return kernel


# ---------------------------- parameter packing -----------------------------

def _pad_wb(w, b):
    w = jnp.pad(w.astype(jnp.float32),
                ((0, FP - w.shape[0]), (0, FP - w.shape[1])))
    b = jnp.pad(b.astype(jnp.float32), ((0, 0), (0, FP - b.shape[1])))
    return w, b


def pack_params(params, dense_layer_num, mlp_layer):
    """Pack per-linear (W [in,out], b [1,out]) pairs into 3 bf16 weight slabs
    and 3 f32 bias slabs (one pair per kernel)."""
    pairs = [(params[2 * i], params[2 * i + 1]) for i in range(len(params) // 2)]
    it = iter(pairs)
    node_dense, edge_dense = [], []
    for _ in range(dense_layer_num):
        node_dense.append(next(it))
        edge_dense.append(next(it))
    vsk, vrk, ek = next(it), next(it), next(it)
    e_mlp = [next(it) for _ in range(mlp_layer - 1)]
    vi, vie = next(it), next(it)
    n_mlp = [next(it) for _ in range(mlp_layer - 1)]

    def slab(padded):
        w = jnp.concatenate([w for w, _ in padded], axis=1).astype(jnp.bfloat16)
        b = jnp.concatenate([b for _, b in padded], axis=1)
        return w, b

    wsk, bsk = _pad_wb(*vsk)
    wrk, brk = _pad_wb(*vrk)
    fused = (jnp.concatenate([wsk, wrk], axis=1),
             jnp.concatenate([bsk, brk], axis=1))

    slab_a = slab([_pad_wb(*p) for p in node_dense] + [fused, _pad_wb(*vi)])
    slab_b = slab([_pad_wb(*p) for p in edge_dense] + [_pad_wb(*ek)] +
                  [_pad_wb(*p) for p in e_mlp])
    slab_c = slab([_pad_wb(*vie)] + [_pad_wb(*p) for p in n_mlp])
    return slab_a, slab_b, slab_c


# --------------------------------- wrapper ----------------------------------

def megnet_block(feat, efeat, src, dst, params, n,
                 dense_layer_num=3, mlp_layer=3,
                 node_tile=256, edge_tile=512,
                 vmem_limit_bytes=48 * 1024 * 1024):
    """Fused MEGNetBlock forward. Returns (vout [N,dim2], eout [E,dim2])."""
    N, in_feats = feat.shape
    E, in_efeats = efeat.shape
    dim1 = params[0].shape[1]
    dim2 = params[-1].shape[1]
    assert max(in_feats, in_efeats, dim1, dim2) <= FP, "feature dims must be <=128"
    if n != 0:
        assert in_feats == dim2 and in_efeats == dim2, \
            "n!=0 residual requires in_feats == in_efeats == dim2"

    f32 = jnp.float32
    tn = min(node_tile, _round_up(N, 8))
    n_pad = _round_up(N, tn)
    te = min(edge_tile, _round_up(E, 8))
    e_pad = _round_up(E, te)

    # lane/row zero-padding (padded rows/cols are masked / sliced away)
    feat_p = jnp.zeros((n_pad, FP), f32).at[:N, :in_feats].set(feat.astype(f32))
    efeat_p = jnp.zeros((e_pad, FP), f32).at[:E, :in_efeats].set(efeat.astype(f32))
    src_p = jnp.zeros((e_pad,), jnp.int32).at[:E].set(src.astype(jnp.int32))
    dst_p = jnp.zeros((e_pad,), jnp.int32).at[:E].set(dst.astype(jnp.int32))
    deg = jnp.zeros((n_pad,), f32).at[dst].add(1.0)
    inv_deg = jnp.where(deg > 0, 1.0 / jnp.maximum(deg, 1.0), 0.0)[:, None]

    (w_a, b_a), (w_b, b_b), (w_c, b_c) = pack_params(params, dense_layer_num,
                                                     mlp_layer)

    def cparams(sem):
        return pltpu.CompilerParams(dimension_semantics=sem,
                                    vmem_limit_bytes=vmem_limit_bytes)

    ga = n_pad // tn
    gb = e_pad // te

    # ---------------- kernel A: node precompute ----------------
    node_tile_spec = pl.BlockSpec((tn, FP), lambda i: (i, 0))
    hx_p, vsk_p, vrk_p, vi_p = pl.pallas_call(
        _make_node_pre_kernel(dense_layer_num),
        out_shape=tuple(jax.ShapeDtypeStruct((n_pad, FP), f32) for _ in range(4)),
        grid=(ga,),
        in_specs=[node_tile_spec,
                  pl.BlockSpec(w_a.shape, lambda i: (0, 0)),
                  pl.BlockSpec(b_a.shape, lambda i: (0, 0))],
        out_specs=tuple(pl.BlockSpec((tn, FP), lambda i: (i, 0))
                        for _ in range(4)),
        compiler_params=cparams(("parallel",)),
    )(feat_p, w_a, b_a)

    # ---------------- kernel B: edge update + aggregation ----------------
    gs_b = pltpu.PrefetchScalarGridSpec(
        num_scalar_prefetch=2,
        grid=(gb,),
        in_specs=[
            pl.BlockSpec((te, FP), lambda k, s, d: (k, 0)),      # efeat tile
            pl.BlockSpec((n_pad, FP), lambda k, s, d: (0, 0)),   # vsk (resident)
            pl.BlockSpec((n_pad, FP), lambda k, s, d: (0, 0)),   # vrk (resident)
            pl.BlockSpec(w_b.shape, lambda k, s, d: (0, 0)),     # weight slab
            pl.BlockSpec(b_b.shape, lambda k, s, d: (0, 0)),     # bias slab
        ],
        out_specs=[
            pl.BlockSpec((te, FP), lambda k, s, d: (k, 0)),      # eout tile
            pl.BlockSpec((n_pad, FP), lambda k, s, d: (0, 0)),   # agg accumulator
        ],
        scratch_shapes=[pltpu.VMEM((te, FP), f32),   # gathered vk tile
                        pltpu.VMEM((te, FP), f32)],  # pre-residual eout tile
    )
    eout_p, agg_p = pl.pallas_call(
        _make_edge_kernel(dense_layer_num, mlp_layer, n, te, E),
        out_shape=(jax.ShapeDtypeStruct((e_pad, FP), f32),
                   jax.ShapeDtypeStruct((n_pad, FP), f32)),
        grid_spec=gs_b,
        compiler_params=cparams(("arbitrary",)),   # carries the accumulator
    )(src_p, dst_p, efeat_p, vsk_p, vrk_p, w_b, b_b)

    # ---------------- kernel C: node update ----------------
    res_p = hx_p if n == 0 else feat_p
    vout_p = pl.pallas_call(
        _make_node_update_kernel(mlp_layer),
        out_shape=jax.ShapeDtypeStruct((n_pad, FP), f32),
        grid=(ga,),
        in_specs=[pl.BlockSpec((tn, FP), lambda i: (i, 0)),
                  pl.BlockSpec((tn, 1), lambda i: (i, 0)),
                  pl.BlockSpec((tn, FP), lambda i: (i, 0)),
                  pl.BlockSpec((tn, FP), lambda i: (i, 0)),
                  pl.BlockSpec(w_c.shape, lambda i: (0, 0)),
                  pl.BlockSpec(b_c.shape, lambda i: (0, 0))],
        out_specs=pl.BlockSpec((tn, FP), lambda i: (i, 0)),
        compiler_params=cparams(("parallel",)),
    )(agg_p, inv_deg, vi_p, res_p, w_c, b_c)

    return vout_p[:N, :dim2], eout_p[:E, :dim2]


# --------------------------- parameter initialization -----------------------

def _xavier_normal(key, in_f, out_f, gain):
    std = gain * (2.0 / (in_f + out_f)) ** 0.5
    return jax.random.normal(key, (in_f, out_f), jnp.float32) * std


def _bias(key, in_f, out_f):
    bound = 1.0 / (in_f ** 0.5)
    return jax.random.uniform(key, (1, out_f), jnp.float32, -bound, bound)


def init_params(key, in_feats, in_efeats, dim1, dim2,
                dense_layer_num, mlp_layer, gain):
    keys = iter(jax.random.split(key, 128))

    def linear(in_f, out_f):
        return [_xavier_normal(next(keys), in_f, out_f, gain),
                _bias(next(keys), in_f, out_f)]

    params = []
    for i in range(dense_layer_num):
        if i == 0:
            nin_n, nin_e, nout = in_feats, in_efeats, dim1
        elif i == dense_layer_num - 1:
            nin_n = nin_e = dim1
            nout = dim2
        else:
            nin_n = nin_e = dim1
            nout = dim1
        params += linear(nin_n, nout)
        params += linear(nin_e, nout)

    hid0 = dim1 if mlp_layer > 1 else dim2
    for _ in range(3):                       # EdgeUpdate: vsk, vrk, ek
        params += linear(dim2, hid0)
    for i in range(1, mlp_layer):
        out_f = dim2 if i == mlp_layer - 1 else dim1
        params += linear(dim1, out_f)
    for _ in range(2):                       # NodeUpdate: vi, vie
        params += linear(dim2, hid0)
    for i in range(1, mlp_layer):
        out_f = dim2 if i == mlp_layer - 1 else dim1
        params += linear(dim1, out_f)
    return params


# ------------------------------ pure-JAX reference --------------------------

def reference_forward(feat, efeat, src, dst, params, n,
                      dense_layer_num, mlp_layer):
    """Same math with the same bf16-operand / f32-accumulate matmul policy."""
    p = list(params)

    def pop():
        w = p.pop(0)
        b = p.pop(0)
        return w, b

    def mm(x, w):
        return jnp.dot(x.astype(jnp.bfloat16), w.astype(jnp.bfloat16),
                       preferred_element_type=jnp.float32)

    relu = lambda x: jnp.maximum(x, 0.0)
    hx, he = feat, efeat
    for _ in range(dense_layer_num):
        w, b = pop(); hx = relu(mm(hx, w) + b)
        w, b = pop(); he = relu(mm(he, w) + b)

    w, b = pop(); vsk = mm(hx, w) + b
    w, b = pop(); vrk = mm(hx, w) + b
    w, b = pop(); ek = mm(he, w) + b
    e = relu(vsk[src] + vrk[dst] + ek)
    for _ in range(1, mlp_layer):
        w, b = pop(); e = relu(mm(e, w) + b)

    w, b = pop(); vi = mm(hx, w) + b
    w_vie, b_vie = pop()
    N = feat.shape[0]
    deg = jnp.zeros((N,), jnp.float32).at[dst].add(1.0)
    agg = jnp.zeros((N, e.shape[1]), jnp.float32).at[dst].add(e)
    agg = agg * jnp.where(deg > 0, 1.0 / jnp.maximum(deg, 1.0), 0.0)[:, None]
    v = relu(vi + mm(agg, w_vie) + b_vie)
    for _ in range(1, mlp_layer):
        w, b = pop(); v = relu(mm(v, w) + b)

    if n == 0:
        return v + hx, e + he
    return v + feat, e + efeat


# ----------------------------------- main ------------------------------------

if __name__ == "__main__":
    key = jax.random.PRNGKey(0)
    N, E = 12, 24
    in_feats = in_efeats = 32           # == dim2 so both residual modes are valid
    dim1, dim2 = 64, 32
    dense_layer_num, mlp_layer = 3, 3
    gain = 2.0 ** 0.5                   # nn.init.calculate_gain('relu')

    k_feat, k_efeat, k_src, k_dst, k_par = jax.random.split(key, 5)
    feat = jax.random.normal(k_feat, (N, in_feats), jnp.float32)
    efeat = jax.random.normal(k_efeat, (E, in_efeats), jnp.float32)
    src = jax.random.randint(k_src, (E,), 0, N)
    dst = jax.random.randint(k_dst, (E,), 0, N)

    params = init_params(k_par, in_feats, in_efeats, dim1, dim2,
                         dense_layer_num, mlp_layer, gain)

    vout, eout = megnet_block(feat, efeat, src, dst, params, n=0,
                              dense_layer_num=dense_layer_num,
                              mlp_layer=mlp_layer)
    jax.block_until_ready((vout, eout))

    ref_v, ref_e = reference_forward(feat, efeat, src, dst, params, 0,
                                     dense_layer_num, mlp_layer)

    assert vout.shape == (N, dim2) and eout.shape == (E, dim2)
    assert bool(jnp.all(jnp.isfinite(vout))) and bool(jnp.all(jnp.isfinite(eout)))
    assert bool(jnp.allclose(vout, ref_v, rtol=1e-2, atol=1e-2))
    assert bool(jnp.allclose(eout, ref_e, rtol=1e-2, atol=1e-2))
    print("KERNEL_OK")
</pallas_src>

<mosaic_0001>
module attributes {stable_mosaic.version = 11 : i64} {
  func.func @kernel(%arg0: i32, %arg1: memref<16x128xf32, #tpu.memory_space<vmem>>, %arg2: memref<128x768xbf16, #tpu.memory_space<vmem>>, %arg3: memref<1x768xf32, #tpu.memory_space<vmem>>, %arg4: memref<16x128xf32, #tpu.memory_space<vmem>>, %arg5: memref<16x128xf32, #tpu.memory_space<vmem>>, %arg6: memref<16x128xf32, #tpu.memory_space<vmem>>, %arg7: memref<16x128xf32, #tpu.memory_space<vmem>>) attributes {dimension_semantics = [#tpu.dimension_semantics<parallel>], iteration_bounds = array<i64: 1>, scalar_prefetch = 0 : i64, scratch_operands = 0 : i64, tpu.core_type = #tpu.core_type<tc>, window_params = [{transform_indices = @transform_0, window_bounds = array<i64: 16, 128>}, {pipeline_mode = #tpu.pipeline_mode<synchronous>, transform_indices = @transform_1, window_bounds = array<i64: 128, 768>}, {pipeline_mode = #tpu.pipeline_mode<synchronous>, transform_indices = @transform_2, window_bounds = array<i64: 1, 768>}, {transform_indices = @transform_3, window_bounds = array<i64: 16, 128>}, {transform_indices = @transform_4, window_bounds = array<i64: 16, 128>}, {transform_indices = @transform_5, window_bounds = array<i64: 16, 128>}, {transform_indices = @transform_6, window_bounds = array<i64: 16, 128>}]} {
    %c0 = arith.constant 0 : index
    %c0_0 = arith.constant 0 : index
    %0 = vector.load %arg1[%c0, %c0_0] : memref<16x128xf32, #tpu.memory_space<vmem>>, vector<16x128xf32>
    %c0_1 = arith.constant 0 : index
    %c0_2 = arith.constant 0 : index
    %1 = vector.load %arg2[%c0_1, %c0_2] : memref<128x768xbf16, #tpu.memory_space<vmem>>, vector<128x128xbf16>
    %c0_3 = arith.constant 0 : index
    %c0_4 = arith.constant 0 : index
    %2 = vector.load %arg3[%c0_3, %c0_4] : memref<1x768xf32, #tpu.memory_space<vmem>>, vector<1x128xf32>
    %3 = arith.truncf %0 : vector<16x128xf32> to vector<16x128xbf16>
    %cst = arith.constant dense<0.000000e+00> : vector<16x128xf32>
    %4 = tpu.matmul %3, %1, %cst {dimension_numbers = #tpu.dot_dimension_numbers<[1], [0], [0], [1], [0, 0, 1, 1], [], []>} : vector<16x128xbf16>, vector<128x128xbf16>, vector<16x128xf32> -> vector<16x128xf32>
    %5 = vector.broadcast %2 : vector<1x128xf32> to vector<16x128xf32>
    %6 = arith.addf %4, %5 : vector<16x128xf32>
    %cst_5 = arith.constant 0.000000e+00 : f32
    %7 = vector.broadcast %cst_5 : f32 to vector<16x128xf32>
    %8 = arith.maximumf %6, %7 : vector<16x128xf32>
    %c0_6 = arith.constant 0 : index
    %c128 = arith.constant 128 : index
    %9 = vector.load %arg2[%c0_6, %c128] : memref<128x768xbf16, #tpu.memory_space<vmem>>, vector<128x128xbf16>
    %c0_7 = arith.constant 0 : index
    %c128_8 = arith.constant 128 : index
    %10 = vector.load %arg3[%c0_7, %c128_8] : memref<1x768xf32, #tpu.memory_space<vmem>>, vector<1x128xf32>
    %11 = arith.truncf %8 : vector<16x128xf32> to vector<16x128xbf16>
    %cst_9 = arith.constant dense<0.000000e+00> : vector<16x128xf32>
    %12 = tpu.matmul %11, %9, %cst_9 {dimension_numbers = #tpu.dot_dimension_numbers<[1], [0], [0], [1], [0, 0, 1, 1], [], []>} : vector<16x128xbf16>, vector<128x128xbf16>, vector<16x128xf32> -> vector<16x128xf32>
    %13 = vector.broadcast %10 : vector<1x128xf32> to vector<16x128xf32>
    %14 = arith.addf %12, %13 : vector<16x128xf32>
    %cst_10 = arith.constant 0.000000e+00 : f32
    %15 = vector.broadcast %cst_10 : f32 to vector<16x128xf32>
    %16 = arith.maximumf %14, %15 : vector<16x128xf32>
    %c0_11 = arith.constant 0 : index
    %c256 = arith.constant 256 : index
    %17 = vector.load %arg2[%c0_11, %c256] : memref<128x768xbf16, #tpu.memory_space<vmem>>, vector<128x128xbf16>
    %c0_12 = arith.constant 0 : index
    %c256_13 = arith.constant 256 : index
    %18 = vector.load %arg3[%c0_12, %c256_13] : memref<1x768xf32, #tpu.memory_space<vmem>>, vector<1x128xf32>
    %19 = arith.truncf %16 : vector<16x128xf32> to vector<16x128xbf16>
    %cst_14 = arith.constant dense<0.000000e+00> : vector<16x128xf32>
    %20 = tpu.matmul %19, %17, %cst_14 {dimension_numbers = #tpu.dot_dimension_numbers<[1], [0], [0], [1], [0, 0, 1, 1], [], []>} : vector<16x128xbf16>, vector<128x128xbf16>, vector<16x128xf32> -> vector<16x128xf32>
    %21 = vector.broadcast %18 : vector<1x128xf32> to vector<16x128xf32>
    %22 = arith.addf %20, %21 : vector<16x128xf32>
    %cst_15 = arith.constant 0.000000e+00 : f32
    %23 = vector.broadcast %cst_15 : f32 to vector<16x128xf32>
    %24 = arith.maximumf %22, %23 : vector<16x128xf32>
    %c0_16 = arith.constant 0 : index
    %c0_17 = arith.constant 0 : index
    %25 = vector.load %arg4[%c0_16, %c0_17] : memref<16x128xf32, #tpu.memory_space<vmem>>, vector<16x128xf32>
    tpu.vector_store %arg4[%c0_16, %c0_17], %24 {strides = array<i32>} : memref<16x128xf32, #tpu.memory_space<vmem>>, vector<16x128xf32>,
    %c0_18 = arith.constant 0 : index
    %c384 = arith.constant 384 : index
    %26 = vector.load %arg2[%c0_18, %c384] : memref<128x768xbf16, #tpu.memory_space<vmem>>, vector<128x256xbf16>
    %c0_19 = arith.constant 0 : index
    %c384_20 = arith.constant 384 : index
    %27 = vector.load %arg3[%c0_19, %c384_20] : memref<1x768xf32, #tpu.memory_space<vmem>>, vector<1x256xf32>
    %28 = arith.truncf %24 : vector<16x128xf32> to vector<16x128xbf16>
    %cst_21 = arith.constant dense<0.000000e+00> : vector<16x256xf32>
    %29 = tpu.matmul %28, %26, %cst_21 {dimension_numbers = #tpu.dot_dimension_numbers<[1], [0], [0], [1], [0, 0, 1, 1], [], []>} : vector<16x128xbf16>, vector<128x256xbf16>, vector<16x256xf32> -> vector<16x256xf32>
    %30 = vector.broadcast %27 : vector<1x256xf32> to vector<16x256xf32>
    %31 = arith.addf %29, %30 : vector<16x256xf32>
    %32 = vector.extract_strided_slice %31 {offsets = [0, 0], sizes = [16, 128], strides = [1, 1]} : vector<16x256xf32> to vector<16x128xf32>
    %c0_22 = arith.constant 0 : index
    %c0_23 = arith.constant 0 : index
    %33 = vector.load %arg5[%c0_22, %c0_23] : memref<16x128xf32, #tpu.memory_space<vmem>>, vector<16x128xf32>
    tpu.vector_store %arg5[%c0_22, %c0_23], %32 {strides = array<i32>} : memref<16x128xf32, #tpu.memory_space<vmem>>, vector<16x128xf32>,
    %34 = vector.extract_strided_slice %31 {offsets = [0, 128], sizes = [16, 128], strides = [1, 1]} : vector<16x256xf32> to vector<16x128xf32>
    %c0_24 = arith.constant 0 : index
    %c0_25 = arith.constant 0 : index
    %35 = vector.load %arg6[%c0_24, %c0_25] : memref<16x128xf32, #tpu.memory_space<vmem>>, vector<16x128xf32>
    tpu.vector_store %arg6[%c0_24, %c0_25], %34 {strides = array<i32>} : memref<16x128xf32, #tpu.memory_space<vmem>>, vector<16x128xf32>,
    %c0_26 = arith.constant 0 : index
    %c640 = arith.constant 640 : index
    %36 = vector.load %arg2[%c0_26, %c640] : memref<128x768xbf16, #tpu.memory_space<vmem>>, vector<128x128xbf16>
    %c0_27 = arith.constant 0 : index
    %c640_28 = arith.constant 640 : index
    %37 = vector.load %arg3[%c0_27, %c640_28] : memref<1x768xf32, #tpu.memory_space<vmem>>, vector<1x128xf32>
    %38 = arith.truncf %24 : vector<16x128xf32> to vector<16x128xbf16>
    %cst_29 = arith.constant dense<0.000000e+00> : vector<16x128xf32>
    %39 = tpu.matmul %38, %36, %cst_29 {dimension_numbers = #tpu.dot_dimension_numbers<[1], [0], [0], [1], [0, 0, 1, 1], [], []>} : vector<16x128xbf16>, vector<128x128xbf16>, vector<16x128xf32> -> vector<16x128xf32>
    %40 = vector.broadcast %37 : vector<1x128xf32> to vector<16x128xf32>
    %41 = arith.addf %39, %40 : vector<16x128xf32>
    %c0_30 = arith.constant 0 : index
    %c0_31 = arith.constant 0 : index
    %42 = vector.load %arg7[%c0_30, %c0_31] : memref<16x128xf32, #tpu.memory_space<vmem>>, vector<16x128xf32>
    tpu.vector_store %arg7[%c0_30, %c0_31], %41 {strides = array<i32>} : memref<16x128xf32, #tpu.memory_space<vmem>>, vector<16x128xf32>,
    return
  }
  func.func @transform_0(%arg0: i32) -> (i32, i32) {
    %c0_i32 = arith.constant 0 : i32
    %c0_i32_0 = arith.constant 0 : i32
    return %arg0, %c0_i32 : i32, i32
  }
  func.func @transform_1(%arg0: i32) -> (i32, i32) {
    %c0_i32 = arith.constant 0 : i32
    %c0_i32_0 = arith.constant 0 : i32
    %c0_i32_1 = arith.constant 0 : i32
    return %c0_i32, %c0_i32_0 : i32, i32
  }
  func.func @transform_2(%arg0: i32) -> (i32, i32) {
    %c0_i32 = arith.constant 0 : i32
    %c0_i32_0 = arith.constant 0 : i32
    %c0_i32_1 = arith.constant 0 : i32
    return %c0_i32, %c0_i32_0 : i32, i32
  }
  func.func @transform_3(%arg0: i32) -> (i32, i32) {
    %c0_i32 = arith.constant 0 : i32
    %c0_i32_0 = arith.constant 0 : i32
    return %arg0, %c0_i32 : i32, i32
  }
  func.func @transform_4(%arg0: i32) -> (i32, i32) {
    %c0_i32 = arith.constant 0 : i32
    %c0_i32_0 = arith.constant 0 : i32
    return %arg0, %c0_i32 : i32, i32
  }
  func.func @transform_5(%arg0: i32) -> (i32, i32) {
    %c0_i32 = arith.constant 0 : i32
    %c0_i32_0 = arith.constant 0 : i32
    return %arg0, %c0_i32 : i32, i32
  }
  func.func @transform_6(%arg0: i32) -> (i32, i32) {
    %c0_i32 = arith.constant 0 : i32
    %c0_i32_0 = arith.constant 0 : i32
    return %arg0, %c0_i32 : i32, i32
  }
}

</mosaic_0001>

<bundles_post_ra>
// kernel: tpu_custom_call.1
= control target key start
LH: loop header
LB: loop body
LE: loop exit
PB: predicated region body
PF: predicated region fallthrough
CT: control target
= control target key end

     0   :  { %12 = vsyncpa [#allocation3], 0  ;;  %s1317_s0 = inlined_call_operand.hbm [shape: f32[16,128], index: 0, kind: input, shape index: {}]   ;;  %s1318_s1 = inlined_call_operand.hbm [shape: bf16[128,768], index: 1, kind: input, shape index: {}]   ;;  %s1319_s2 = inlined_call_operand.vmem [shape: f32[1,768], index: 2, kind: input, shape index: {}]   ;;  %s1320_s3 = inlined_call_operand.hbm [shape: f32[16,128], index: 3, kind: output, shape index: {0}]   ;;  %s1321_s4 = inlined_call_operand.hbm [shape: f32[16,128], index: 4, kind: output, shape index: {1}]   ;;  %s1322_s5 = inlined_call_operand.hbm [shape: f32[16,128], index: 5, kind: output, shape index: {2}]   ;;  %s1323_s6 = inlined_call_operand.hbm [shape: f32[16,128], index: 6, kind: output, shape index: {3}]  }
   0x1   :  { %13 = vsyncpa [#allocation6], 0 }
   0x2   :  { %14 = vsyncpa [#allocation4], 0 }
   0x3   :  { %15 = vsyncpa [#allocation9], 0 }
   0x4   :  { %16 = vsyncpa [#allocation12], 0  ;;  %s1113_s21 = smov [#allocation2]   ;;  %s971_s25 = scalar_lea.hbm %s1317_s0, 256 }
   0x5   :  { %s22_s22 = sshll.u32 %s1113_s21, 4  ;;  %p972_p0 = scmp.ne.s32.totalorder %s1317_s0, %s971_s25  ;;  %s23_s22 = int_to_ptr.vmem [resolvable:$true] %s22_s22 }
   0x6   :  { %p975_p1 = scmp.lt.u32.totalorder %s971_s25, %s1317_s0 }
   0x8   :  { %p977_p2 = pnand %p975_p1, %p972_p0 }
   0xa   :  { %980 = shalt.err (!%p977_p2)
}
   0xb   :  { %s981_s30 = scalar_lea.vmem %s23_s22, 256  ;;  %p986_p4 = scmp.lt.s32.totalorder %s23_s22, %s23_s22 }
   0xc   :  { %p982_p3 = scmp.ne.s32.totalorder %s23_s22, %s981_s30  ;;  %p987_p5 = scmp.lt.s32.totalorder %s981_s30, %s981_s30 }
   0xe   :  { %p988_p6 = por %p987_p5, %p986_p4 }
  0x10   :  { %p989_p7 = pnand %p988_p6, %p982_p3 }
  0x12   :  { %992 = shalt.err (!%p989_p7)
}
  0x13   :  { %s1114_s7 = smov 128   ;;  %s1115_s8 = smov 8  }
  0x14   :  { %28 = dma.hbm_to_vmem [thread:$0]  %s1317_s0, 256, %s23_s22, [#allocation3], %s1114_s7, %s1114_s7, %s1115_s8  }
  0x15   :  { %s1116_s11 = smov [#allocation5]   ;;  %s993_s15 = scalar_lea.hbm %s1318_s1, 6144 }
  0x16   :  { %s34_s12 = sshll.u32 %s1116_s11, 4  ;;  %p994_p8 = scmp.ne.s32.totalorder %s1318_s1, %s993_s15  ;;  %s35_s12 = int_to_ptr.vmem [resolvable:$true] %s34_s12 }
  0x17   :  { %p997_p9 = scmp.lt.u32.totalorder %s993_s15, %s1318_s1 }
  0x19   :  { %p999_p10 = pnand %p997_p9, %p994_p8 }
  0x1b   :  { %1002 = shalt.err (!%p999_p10)
}
  0x1c   :  { %s1003_s20 = scalar_lea.vmem %s35_s12, 6144  ;;  %p1008_p12 = scmp.lt.s32.totalorder %s35_s12, %s35_s12 }
  0x1d   :  { %p1004_p11 = scmp.ne.s32.totalorder %s35_s12, %s1003_s20  ;;  %p1009_p13 = scmp.lt.s32.totalorder %s1003_s20, %s1003_s20 }
  0x1f   :  { %p1010_p0 = por %p1009_p13, %p1008_p12 }
  0x21   :  { %p1011_p1 = pnand %p1010_p0, %p1004_p11 }
  0x23   :  { %1014 = shalt.err (!%p1011_p1)
}
  0x24   :  { %s1117_s0 = smov 384   ;;  %s1118_s21 = smov 24  }
  0x25   :  { %40 = dma.hbm_to_vmem [thread:$0]  %s1318_s1, 6144, %s35_s12, [#allocation6], %s1117_s0, %s1117_s0, %s1118_s21  }
  0x26   :  { %1103 = dma.done.wait [#allocation3], 256  }
  0x27   :  { %1104 = vsyncadd [#allocation3], 4294967040 }
  0x28   :  { %1105 = dma.done.wait [#allocation6], 6144  }
  0x29   :  { %1106 = vsyncadd [#allocation6], 4294961152  ;;  %v1119_v0 = vmov 0.0   ;;  %vm1120_vm0 = vmmov 0   ;;  %v915_v1 = vld [vmem:[#allocation5] ss:$24 sps:$4 sm:$0xff]  }
  0x2a   :  { %822 = vmatprep.subr.bf16.mxu0 %v1119_v0  ;;  %838 = vmatprep.mubr.msk.bf16.mxu0 %vm1120_vm0, %v1119_v0  ;;  %v916_v2 = vld [vmem:[#allocation5 + $0x30] ss:$24 sps:$4 sm:$0xff]   ;;  %v917_v3 = vld [vmem:[#allocation5 + $0x60] ss:$24 sps:$4 sm:$0xff]   ;;  %v923_v4 = vld [vmem:[#allocation5 + $0x4] ss:$24 sps:$4 sm:$0xff]  }
  0x2b   :  { %842 = vmatprep.subr.bf16.mxu1 %v1119_v0  ;;  %858 = vmatprep.mubr.msk.bf16.mxu1 %vm1120_vm0, %v1119_v0  ;;  %v918_v5 = vld [vmem:[#allocation5 + $0x90] ss:$24 sps:$4 sm:$0xff]   ;;  %v924_v6 = vld [vmem:[#allocation5 + $0x34] ss:$24 sps:$4 sm:$0xff]   ;;  %v919_v7 = vld [vmem:[#allocation5 + $0xc0] ss:$24 sps:$4 sm:$0xff]  }
  0x2c   :  { %823 = vmatpush3.bf16.msra.mxu0 %v915_v1  ;;  %843 = vmatpush3.bf16.msra.mxu1 %v923_v4  ;;  %v925_v8 = vld [vmem:[#allocation5 + $0x64] ss:$24 sps:$4 sm:$0xff]   ;;  %v920_v9 = vld [vmem:[#allocation5 + $0xf0] ss:$24 sps:$4 sm:$0xff]   ;;  %v926_v10 = vld [vmem:[#allocation5 + $0x94] ss:$24 sps:$4 sm:$0xff]  }
  0x2d   :  { %824 = vmatprep.subr.bf16.mxu0 %v1119_v0  ;;  %844 = vmatprep.subr.bf16.mxu1 %v1119_v0  ;;  %v921_v11 = vld [vmem:[#allocation5 + $0x120] ss:$24 sps:$4 sm:$0xff]   ;;  %v927_v12 = vld [vmem:[#allocation5 + $0xc4] ss:$24 sps:$4 sm:$0xff]   ;;  %v922_v13 = vld [vmem:[#allocation5 + $0x150] ss:$24 sps:$4 sm:$0xff]  }
  0x2e   :  { %v50_v14 = vld [vmem:[#allocation2] sm:$0xff]  ;;  %v51_v15 = vld [vmem:[#allocation2 + $0x8] sm:$0xff]  ;;  %v931_v20 = vld [vmem:[#allocation5 + $0x8] ss:$24 sps:$4 sm:$0xff]   ;;  %s1122_s29 = smov [#allocation7]  }
  0x2f   :  { %v928_v16 = vld [vmem:[#allocation5 + $0xf4] ss:$24 sps:$4 sm:$0xff]   ;;  %v69_v17 = vpack.c.bf16 %v51_v15, %v50_v14  ;;  %v929_v18 = vld [vmem:[#allocation5 + $0x124] ss:$24 sps:$4 sm:$0xff]   ;;  %v932_v21 = vld [vmem:[#allocation5 + $0x38] ss:$24 sps:$4 sm:$0xff]  }
  0x30   :  { %825 = vmatpush3.bf16.msra.mxu0 %v916_v2  ;;  %845 = vmatpush3.bf16.msra.mxu1 %v924_v6  ;;  %v930_v19 = vld [vmem:[#allocation5 + $0x154] ss:$24 sps:$4 sm:$0xff]   ;;  %v933_v22 = vld [vmem:[#allocation5 + $0x68] ss:$24 sps:$4 sm:$0xff]   ;;  %v934_v23 = vld [vmem:[#allocation5 + $0x98] ss:$24 sps:$4 sm:$0xff]  }
  0x31   :  { %826 = vmatprep.subr.bf16.mxu0 %v1119_v0  ;;  %846 = vmatprep.subr.bf16.mxu1 %v1119_v0  ;;  %v935_v24 = vld [vmem:[#allocation5 + $0xc8] ss:$24 sps:$4 sm:$0xff]   ;;  %v936_v25 = vld [vmem:[#allocation5 + $0xf8] ss:$24 sps:$4 sm:$0xff]   ;;  %v939_v38 = vld [vmem:[#allocation5 + $0xc] ss:$24 sps:$4 sm:$0xff]  }
  0x32   :  { %v734_v26 = vld [vmem:[%s1319_s2] ss:$0 sm:$0xff]  ;;  %v937_v36 = vld [vmem:[#allocation5 + $0x128] ss:$24 sps:$4 sm:$0xff]   ;;  %v943_v41 = vld [vmem:[#allocation5 + $0x3c] ss:$24 sps:$4 sm:$0xff]  }
  0x33   :  { %v938_v37 = vld [vmem:[#allocation5 + $0x158] ss:$24 sps:$4 sm:$0xff]   ;;  %v947_v43 = vld [vmem:[#allocation5 + $0x6c] ss:$24 sps:$4 sm:$0xff]   ;;  %v951_v45 = vld [vmem:[#allocation5 + $0x9c] ss:$24 sps:$4 sm:$0xff]  }
  0x34   :  { %827 = vmatpush3.bf16.msra.mxu0 %v917_v3  ;;  %847 = vmatpush3.bf16.msra.mxu1 %v925_v8  ;;  %v941_v39 = vld [vmem:[#allocation5 + $0x10] ss:$24 sps:$4 sm:$0xff]   ;;  %v945_v40 = vld [vmem:[#allocation5 + $0x40] ss:$24 sps:$4 sm:$0xff]   ;;  %v955_v47 = vld [vmem:[#allocation5 + $0xcc] ss:$24 sps:$4 sm:$0xff]  }
  0x35   :  { %828 = vmatprep.subr.bf16.mxu0 %v1119_v0  ;;  %848 = vmatprep.subr.bf16.mxu1 %v1119_v0  ;;  %v949_v42 = vld [vmem:[#allocation5 + $0x70] ss:$24 sps:$4 sm:$0xff]   ;;  %v953_v44 = vld [vmem:[#allocation5 + $0xa0] ss:$24 sps:$4 sm:$0xff]   ;;  %v959_v49 = vld [vmem:[#allocation5 + $0xfc] ss:$24 sps:$4 sm:$0xff]  }
  0x36   :  { %v957_v46 = vld [vmem:[#allocation5 + $0xd0] ss:$24 sps:$4 sm:$0xff]   ;;  %v961_v48 = vld [vmem:[#allocation5 + $0x100] ss:$24 sps:$4 sm:$0xff]   ;;  %v942_v59 = vld [vmem:[#allocation5 + $0x14] ss:$24 sps:$4 sm:$0xff]  }
  0x37   :  { %v743_v50 = vld [vmem:[%s1319_s2 + $0x1] ss:$0 sm:$0xff]  ;;  %v946_v61 = vld [vmem:[#allocation5 + $0x44] ss:$24 sps:$4 sm:$0xff]   ;;  %v950_v62 = vld [vmem:[#allocation5 + $0x74] ss:$24 sps:$4 sm:$0xff]  }
  0x38   :  { %829 = vmatpush3.bf16.msra.mxu0 %v918_v5  ;;  %849 = vmatpush3.bf16.msra.mxu1 %v926_v10  ;;  %v954_v63 = vld [vmem:[#allocation5 + $0xa4] ss:$24 sps:$4 sm:$0xff]   ;;  %v958_v1 = vld [vmem:[#allocation5 + $0xd4] ss:$24 sps:$4 sm:$0xff]   ;;  %v965_v3 = vld [vmem:[#allocation5 + $0x130] ss:$24 sps:$4 sm:$0xff]  }
  0x39   :  { %830 = vmatprep.subr.bf16.mxu0 %v1119_v0  ;;  %850 = vmatprep.subr.bf16.mxu1 %v1119_v0  ;;  %v962_v2 = vld [vmem:[#allocation5 + $0x104] ss:$24 sps:$4 sm:$0xff]   ;;  %v966_v5 = vld [vmem:[#allocation5 + $0x134] ss:$24 sps:$4 sm:$0xff]   ;;  %v969_v6 = vld [vmem:[#allocation5 + $0x160] ss:$24 sps:$4 sm:$0xff]  }
  0x3a   :  { %v963_v4 = vld [vmem:[#allocation5 + $0x12c] ss:$24 sps:$4 sm:$0xff]   ;;  %v752_v10 = vld [vmem:[%s1319_s2 + $0x2] ss:$0 sm:$0xff]  ;;  %s674_s30 = sshll.u32 %s1122_s29, 4  ;;  %s675_s30 = int_to_ptr.vmem [resolvable:$true] %s674_s30 }
  0x3b   :  { %v970_v8 = vld [vmem:[#allocation5 + $0x164] ss:$24 sps:$4 sm:$0xff]   ;;  %s1015_s9 = scalar_lea.vmem %s675_s30, 256  ;;  %p1020_p3 = scmp.lt.s32.totalorder %s675_s30, %s675_s30 }
  0x3c   :  { %831 = vmatpush3.bf16.msra.mxu0 %v919_v7  ;;  %851 = vmatpush3.bf16.msra.mxu1 %v927_v12  ;;  %v967_v7 = vld [vmem:[#allocation5 + $0x15c] ss:$24 sps:$4 sm:$0xff]   ;;  %p1016_p2 = scmp.ne.s32.totalorder %s675_s30, %s1015_s9  ;;  %p1021_p4 = scmp.lt.s32.totalorder %s1015_s9, %s1015_s9 }
  0x3d   :  { %832 = vmatprep.subr.bf16.mxu0 %v1119_v0  ;;  %852 = vmatprep.subr.bf16.mxu1 %v1119_v0 }
  0x3e   :  { %p1022_p5 = por %p1021_p4, %p1020_p3 }
  0x40   :  { %833 = vmatpush3.bf16.msra.mxu0 %v920_v9  ;;  %853 = vmatpush3.bf16.msra.mxu1 %v928_v16  ;;  %v1121_v9 = vmov 0   ;;  %p1023_p6 = pnand %p1022_p5, %p1016_p2 }
  0x41   :  { %834 = vmatprep.subr.bf16.mxu0 %v1119_v0  ;;  %854 = vmatprep.subr.bf16.mxu1 %v1119_v0 }
  0x44   :  { %835 = vmatpush3.bf16.msra.mxu0 %v921_v11  ;;  %855 = vmatpush3.bf16.msra.mxu1 %v929_v18 }
  0x45   :  { %836 = vmatprep.subr.bf16.mxu0 %v1119_v0  ;;  %856 = vmatprep.subr.bf16.mxu1 %v1119_v0 }
  0x48   :  { %837 = vmatpush3.bf16.msra.mxu0 %v922_v13  ;;  %857 = vmatpush3.bf16.msra.mxu1 %v930_v19 }
  0x49   :  { %862 = vmatprep.subr.bf16.mxu0 %v1119_v0  ;;  %508 = vmatprep.subr.bf16.mxu1 %v941_v39 }
  0x4b   :  { %839 = vmatmul.mubr.bf16.vlgmr.msra.gmra.mrb[0].mxu0 %v69_v17 }
  0x4c   :  { %878 = vmatprep.mubr.msk.bf16.mxu0 %vm1120_vm0, %v1119_v0  ;;  %863 = vmatpush3.bf16.msra.mxu0 %v931_v20 }
  0x4d   :  { %864 = vmatprep.subr.bf16.mxu0 %v1119_v0 }
  0x50   :  { %865 = vmatpush3.bf16.msra.mxu0 %v932_v21 }
  0x51   :  { %866 = vmatprep.subr.bf16.mxu0 %v1119_v0 }
  0x54   :  { %867 = vmatpush3.bf16.msra.mxu0 %v933_v22 }
  0x55   :  { %868 = vmatprep.subr.bf16.mxu0 %v1119_v0 }
  0x58   :  { %869 = vmatpush3.bf16.msra.mxu0 %v934_v23 }
  0x59   :  { %870 = vmatprep.subr.bf16.mxu0 %v1119_v0 }
  0x5c   :  { %871 = vmatpush3.bf16.msra.mxu0 %v935_v24 }
  0x5d   :  { %872 = vmatprep.subr.bf16.mxu0 %v1119_v0 }
  0x60   :  { %873 = vmatpush3.bf16.msra.mxu0 %v936_v25 }
  0x61   :  { %874 = vmatprep.subr.bf16.mxu0 %v1119_v0 }
  0x64   :  { %875 = vmatpush3.bf16.msra.mxu0 %v937_v36 }
  0x65   :  { %876 = vmatprep.subr.bf16.mxu0 %v1119_v0 }
  0x68   :  { %877 = vmatpush3.bf16.msra.mxu0 %v938_v37 }
  0x69   :  { %882 = vmatprep.subr.bf16.mxu0 %v1119_v0 }
 0x11e   :  { %v158_v27 = vpop.f32.mrb[0].mxu0 }
 0x11f   :  { %v159_v28 = vadd.f32 %v734_v26, %v158_v27  ;;  %v840_v29 = vpop.f32.mrb[1].mxu0 }
 0x120   :  { %v161_v30 = vpop.f32.mrb[2].mxu0 }
 0x121   :  { %v162_v31 = vadd.f32 %v734_v26, %v161_v30  ;;  %v841_v32 = vpop.f32.mrb[3].mxu0  ;;  %v165_v33 = vmax.f32 %v159_v28, 0.0 }
 0x123   :  { %v166_v34 = vmax.f32 %v162_v31, 0.0 }
 0x125   :  { %v184_v35 = vpack.c.bf16 %v166_v34, %v165_v33 }
 0x127   :  { %859 = vmatmul.mubr.bf16.vlgmr.msra.gmra.mrb[0].mxu1 %v184_v35 }
 0x128   :  { %509 = vmatpush1.bf16.msra.mxu1 %v939_v38  ;;  %540 = vmatprep.mubr.bf16.mxu1 %v1121_v9 }
 0x129   :  { %510 = vmatprep.subr.bf16.mxu1 %v945_v40 }
 0x12c   :  { %511 = vmatpush1.bf16.msra.mxu1 %v943_v41 }
 0x12d   :  { %512 = vmatprep.subr.bf16.mxu1 %v949_v42 }
 0x130   :  { %513 = vmatpush1.bf16.msra.mxu1 %v947_v43 }
 0x131   :  { %514 = vmatprep.subr.bf16.mxu1 %v953_v44 }
 0x134   :  { %515 = vmatpush1.bf16.msra.mxu1 %v951_v45 }
 0x135   :  { %516 = vmatprep.subr.bf16.mxu1 %v957_v46 }
 0x138   :  { %517 = vmatpush1.bf16.msra.mxu1 %v955_v47 }
 0x139   :  { %518 = vmatprep.subr.bf16.mxu1 %v961_v48 }
 0x13c   :  { %519 = vmatpush1.bf16.msra.mxu1 %v959_v49 }
 0x13d   :  { %520 = vmatprep.subr.bf16.mxu1 %v965_v3 }
 0x140   :  { %521 = vmatpush1.bf16.msra.mxu1 %v963_v4 }
 0x141   :  { %522 = vmatprep.subr.bf16.mxu1 %v969_v6 }
 0x144   :  { %523 = vmatpush1.bf16.msra.mxu1 %v967_v7 }
 0x1fa   :  { %v273_v51 = vpop.f32.mrb[0].mxu1 }
 0x1fb   :  { %v274_v52 = vadd.f32 %v743_v50, %v273_v51  ;;  %v860_v53 = vpop.f32.mrb[1].mxu1 }
 0x1fc   :  { %v276_v54 = vpop.f32.mrb[2].mxu1 }
 0x1fd   :  { %v277_v55 = vadd.f32 %v743_v50, %v276_v54  ;;  %v861_v56 = vpop.f32.mrb[3].mxu1  ;;  %v280_v57 = vmax.f32 %v274_v52, 0.0 }
 0x1ff   :  { %v281_v58 = vmax.f32 %v277_v55, 0.0 }
 0x201   :  { %v299_v60 = vpack.c.bf16 %v281_v58, %v280_v57 }
 0x203   :  { %879 = vmatmul.mubr.bf16.vlgmr.msra.gmra.mrb[4].mxu0 %v299_v60 }
 0x204   :  { %883 = vmatpush3.bf16.msra.mxu0 %v942_v59  ;;  %898 = vmatprep.mubr.msk.bf16.mxu0 %vm1120_vm0, %v1119_v0 }
 0x205   :  { %884 = vmatprep.subr.bf16.mxu0 %v1119_v0 }
 0x208   :  { %885 = vmatpush3.bf16.msra.mxu0 %v946_v61 }
 0x209   :  { %886 = vmatprep.subr.bf16.mxu0 %v1119_v0 }
 0x20c   :  { %887 = vmatpush3.bf16.msra.mxu0 %v950_v62 }
 0x20d   :  { %888 = vmatprep.subr.bf16.mxu0 %v1119_v0 }
 0x210   :  { %889 = vmatpush3.bf16.msra.mxu0 %v954_v63 }
 0x211   :  { %890 = vmatprep.subr.bf16.mxu0 %v1119_v0 }
 0x214   :  { %891 = vmatpush3.bf16.msra.mxu0 %v958_v1 }
 0x215   :  { %892 = vmatprep.subr.bf16.mxu0 %v1119_v0 }
 0x218   :  { %893 = vmatpush3.bf16.msra.mxu0 %v962_v2 }
 0x219   :  { %894 = vmatprep.subr.bf16.mxu0 %v1119_v0 }
 0x21c   :  { %895 = vmatpush3.bf16.msra.mxu0 %v966_v5 }
 0x21d   :  { %896 = vmatprep.subr.bf16.mxu0 %v1119_v0 }
 0x220   :  { %897 = vmatpush3.bf16.msra.mxu0 %v970_v8 }
 0x2d6   :  { %v388_v11 = vpop.f32.mrb[4].mxu0 }
 0x2d7   :  { %v389_v12 = vadd.f32 %v752_v10, %v388_v11  ;;  %v880_v13 = vpop.f32.mrb[5].mxu0 }
 0x2d8   :  { %v391_v14 = vpop.f32.mrb[6].mxu0 }
 0x2d9   :  { %v395_v15 = vmax.f32 %v389_v12, 0.0  ;;  %v392_v16 = vadd.f32 %v752_v10, %v391_v14  ;;  %v881_v17 = vpop.f32.mrb[7].mxu0 }
 0x2db   :  { %397 = vst [vmem:[#allocation7] sm:$0xff] %v395_v15  ;;  %v396_v0 = vmax.f32 %v392_v16, 0.0 }
 0x2dd   :  { %398 = vst [vmem:[#allocation7 + $0x8] sm:$0xff] %v396_v0  ;;  %v416_v18 = vpack.c.bf16 %v396_v0, %v395_v15 }
 0x2df   :  { %541 = vmatmul.mubr.bf16.vlgmr.msra.gmra.mrb[4].mxu1 %v416_v18  ;;  %899 = vmatmul.mubr.bf16.vlgmr.msra.gmra.mrb[8].mxu0 %v416_v18 }
 0x2e0   :  { %1026 = shalt.err (!%p1023_p6)
}
 0x2e1   :  { %s1027_s12 = scalar_lea.hbm %s1320_s3, 256 }
 0x2e2   :  { %p1028_p7 = scmp.ne.s32.totalorder %s1320_s3, %s1027_s12  ;;  %p1031_p8 = scmp.lt.u32.totalorder %s1027_s12, %s1320_s3 }
 0x2e4   :  { %p1033_p9 = pnand %p1031_p8, %p1028_p7 }
 0x2e6   :  { %1036 = shalt.err (!%p1033_p9)
}
 0x2e7   :  { %680 = dma.vmem_to_hbm [thread:$0]  %s675_s30, 256, %s1320_s3, [#allocation4], %s1114_s7, %s1114_s7, %s1115_s8   ;;  %v418_v19 = vlaneseq }
 0x2e8   :  { %v415_v22 = vld [vmem:[%s1319_s2 + $0x3] sm:$0x3]  ;;  %v777_v25 = vld [vmem:[%s1319_s2 + $0x5] ss:$0 sm:$0xff]  ;;  %s1123_s22 = smov [#allocation8]   ;;  %s1124_s3 = smov [#allocation10]  }
 0x2e9   :  { %v419_v20 = vshrl.u32 %v418_v19, 7  ;;  %s686_s23 = sshll.u32 %s1123_s22, 4  ;;  %s698_s1 = sshll.u32 %s1124_s3, 4  ;;  %s687_s23 = int_to_ptr.vmem [resolvable:$true] %s686_s23  ;;  %s1258_s1 = int_to_ptr.vmem [resolvable:$true] %s698_s1 }
 0x2ea   :  { %s1125_s24 = smov [#allocation11]   ;;  %s1037_s2 = scalar_lea.vmem %s687_s23, 256 }
 0x2eb   :  { %v420_v21 = vsub.s32 0, %v419_v20  ;;  %v424_v23 = vsub.s32 1, %v419_v20  ;;  %s710_s25 = sshll.u32 %s1125_s24, 4  ;;  %p1038_p10 = scmp.ne.s32.totalorder %s687_s23, %s1037_s2  ;;  %s1260_s25 = int_to_ptr.vmem [resolvable:$true] %s710_s25 }
 0x2ec   :  { %p1042_p11 = scmp.lt.s32.totalorder %s687_s23, %s687_s23  ;;  %p1043_p12 = scmp.lt.s32.totalorder %s1037_s2, %s1037_s2 }
 0x2ed   :  { %v421_v24 = vrot.slane %v415_v22, %v420_v21  ;;  %v425_v26 = vrot.slane %v415_v22, %v424_v23 }
 0x2ee   :  { %p1044_p13 = por %p1043_p12, %p1042_p11 }
 0x2f0   :  { %p1045_p0 = pnand %p1044_p13, %p1038_p10 }
 0x3b2   :  { %v542_v27 = vpop.f32.mrb[4].mxu1  ;;  %v660_v28 = vpop.f32.mrb[8].mxu0 }
 0x3b3   :  { %v543_v29 = vadd.f32 %v542_v27, %v421_v24  ;;  %v661_v30 = vadd.f32 %v777_v25, %v660_v28  ;;  %v544_v31 = vpop.f32.mrb[5].mxu1  ;;  %v900_v32 = vpop.f32.mrb[9].mxu0 }
 0x3b4   :  { %v545_v33 = vadd.f32 %v544_v31, %v425_v26  ;;  %v546_v34 = vpop.f32.mrb[6].mxu1  ;;  %v663_v35 = vpop.f32.mrb[10].mxu0 }
 0x3b5   :  { %551 = vst [vmem:[#allocation8] sm:$0xff] %v543_v29  ;;  %667 = vst [vmem:[#allocation11] sm:$0xff] %v661_v30  ;;  %v547_v36 = vadd.f32 %v546_v34, %v421_v24  ;;  %v664_v37 = vadd.f32 %v777_v25, %v663_v35  ;;  %v548_v38 = vpop.f32.mrb[7].mxu1  ;;  %v901_v39 = vpop.f32.mrb[11].mxu0 }
 0x3b6   :  { %553 = vst [vmem:[#allocation10] sm:$0xff] %v545_v33  ;;  %v549_v40 = vadd.f32 %v548_v38, %v425_v26 }
 0x3b7   :  { %552 = vst [vmem:[#allocation8 + $0x8] sm:$0xff] %v547_v36  ;;  %668 = vst [vmem:[#allocation11 + $0x8] sm:$0xff] %v664_v37 }
 0x3b8   :  { %554 = vst [vmem:[#allocation10 + $0x8] sm:$0xff] %v549_v40 }
 0x3b9   :  { %1048 = shalt.err (!%p1045_p0)
}
 0x3ba   :  { %s1049_s28 = scalar_lea.hbm %s1321_s4, 256 }
 0x3bb   :  { %p1050_p1 = scmp.ne.s32.totalorder %s1321_s4, %s1049_s28  ;;  %p1053_p2 = scmp.lt.u32.totalorder %s1049_s28, %s1321_s4 }
 0x3bd   :  { %p1055_p3 = pnand %p1053_p2, %p1050_p1 }
 0x3bf   :  { %1058 = shalt.err (!%p1055_p3)
}
 0x3c0   :  { %692 = dma.vmem_to_hbm [thread:$0]  %s687_s23, 256, %s1321_s4, [#allocation9], %s1114_s7, %s1114_s7, %s1115_s8  }
 0x3c1   :  { %s1059_s13 = scalar_lea.vmem %s1258_s1, 256  ;;  %p1064_p5 = scmp.lt.s32.totalorder %s1258_s1, %s1258_s1 }
 0x3c2   :  { %p1060_p4 = scmp.ne.s32.totalorder %s1258_s1, %s1059_s13  ;;  %p1065_p6 = scmp.lt.s32.totalorder %s1059_s13, %s1059_s13 }
 0x3c4   :  { %p1066_p7 = por %p1065_p6, %p1064_p5 }
 0x3c6   :  { %p1067_p8 = pnand %p1066_p7, %p1060_p4 }
 0x3c8   :  { %1070 = shalt.err (!%p1067_p8)
}
 0x3c9   :  { %s1071_s16 = scalar_lea.hbm %s1322_s5, 256 }
 0x3ca   :  { %p1072_p9 = scmp.ne.s32.totalorder %s1322_s5, %s1071_s16  ;;  %p1075_p10 = scmp.lt.u32.totalorder %s1071_s16, %s1322_s5 }
 0x3cc   :  { %p1077_p11 = pnand %p1075_p10, %p1072_p9 }
 0x3ce   :  { %1080 = shalt.err (!%p1077_p11)
}
 0x3cf   :  { %704 = dma.vmem_to_hbm [thread:$0]  %s1258_s1, 256, %s1322_s5, [#allocation9], %s1114_s7, %s1114_s7, %s1115_s8  }
 0x3d0   :  { %s1081_s21 = scalar_lea.vmem %s1260_s25, 256  ;;  %p1086_p13 = scmp.lt.s32.totalorder %s1260_s25, %s1260_s25 }
 0x3d1   :  { %p1082_p12 = scmp.ne.s32.totalorder %s1260_s25, %s1081_s21  ;;  %p1087_p0 = scmp.lt.s32.totalorder %s1081_s21, %s1081_s21 }
 0x3d3   :  { %p1088_p1 = por %p1087_p0, %p1086_p13 }
 0x3d5   :  { %p1089_p2 = pnand %p1088_p1, %p1082_p12 }
 0x3d7   :  { %1092 = shalt.err (!%p1089_p2)
}
 0x3d8   :  { %s1093_s3 = scalar_lea.hbm %s1323_s6, 256 }
 0x3d9   :  { %p1094_p3 = scmp.ne.s32.totalorder %s1323_s6, %s1093_s3  ;;  %p1097_p4 = scmp.lt.u32.totalorder %s1093_s3, %s1323_s6 }
 0x3db   :  { %p1099_p5 = pnand %p1097_p4, %p1094_p3 }
 0x3dd   :  { %1102 = shalt.err (!%p1099_p5)
}
 0x3de   :  { %716 = dma.vmem_to_hbm [thread:$0]  %s1260_s25, 256, %s1323_s6, [#allocation12], %s1114_s7, %s1114_s7, %s1115_s8  }
 0x3df   :  { %1107 = dma.done.wait [#allocation4], 256  }
 0x3e0   :  { %1108 = vsyncadd [#allocation4], 4294967040 }
 0x3e1   :  { %1109 = dma.done.wait [#allocation9], 512  }
 0x3e2   :  { %1110 = vsyncadd [#allocation9], 4294966784 }
 0x3e3   :  { %1111 = dma.done.wait [#allocation12], 256  }
 0x3e4   :  { %1112 = vsyncadd [#allocation12], 4294967040 }
 0x3e5   :  { %729 = vsyncpa [#allocation3], 1 }
 0x3e6   :  { %730 = vsyncpa [#allocation6], 1 }
 0x3e7   :  { %731 = vsyncpa [#allocation4], 1 }
 0x3e8   :  { %732 = vsyncpa [#allocation9], 1 }
 0x3e9   :  { %733 = vsyncpa [#allocation12], 1 }

</bundles_post_ra>
